<compile_context>
chip_gen: v6e
topology: v6e:2x2x1
jax: 0.10.0
libtpu: 0.0.40
codegen_flags: <defaults>
</compile_context>

<pallas_src>
import functools

import jax
import jax.numpy as jnp
import numpy as np
from jax.experimental import pallas as pl
from jax.experimental.pallas import tpu as pltpu

LOG_STD_MIN, LOG_STD_MAX = -20.0, 2.0
_HALF_LOG_2PI = 0.5 * float(np.log(2.0 * np.pi))
_LOG_2 = float(np.log(2.0))


# --------------------------------- kernels -----------------------------------
def _deterministic_kernel(x_ref, w_ref, b_ref, act_ref, logp_ref, *, act_dim, act_limit):
    x = x_ref[...]                                                          # (BT, L)
    y = jnp.dot(x, w_ref[...], preferred_element_type=jnp.float32) + b_ref[...]  # (BT, 2A) fused mu|log_std
    mu = y[:, :act_dim]
    log_std = jnp.clip(y[:, act_dim:], LOG_STD_MIN, LOG_STD_MAX)
    # deterministic: pre-squash action == mu, so Normal(mu, std).log_prob(mu) = -log_std - 0.5*log(2*pi)
    logp = jnp.sum(-log_std - _HALF_LOG_2PI, axis=-1, keepdims=True)
    logp = logp - jnp.sum(2.0 * (_LOG_2 - mu - jax.nn.softplus(-2.0 * mu)),
                          axis=-1, keepdims=True)
    act_ref[...] = act_limit * jnp.tanh(mu)
    logp_ref[...] = logp


def _given_actions_kernel(x_ref, a_ref, w_ref, b_ref, logp_ref, *, act_dim, act_limit, eps):
    x = x_ref[...]
    y = jnp.dot(x, w_ref[...], preferred_element_type=jnp.float32) + b_ref[...]
    mu = y[:, :act_dim]
    log_std = jnp.clip(y[:, act_dim:], LOG_STD_MIN, LOG_STD_MAX)
    a = jnp.clip(a_ref[...] / act_limit, -1.0 + eps, 1.0 - eps)
    u = 0.5 * jnp.log((1.0 + a) / (1.0 - a))                                # atanh, via EUP log
    z = (u - mu) * jnp.exp(-log_std)                                        # (u - mu)/std without a VPU divide
    logp = jnp.sum(-0.5 * z * z - log_std - _HALF_LOG_2PI, axis=-1, keepdims=True)
    logp = logp - jnp.sum(2.0 * (_LOG_2 - u - jax.nn.softplus(-2.0 * u)),
                          axis=-1, keepdims=True)
    logp_ref[...] = logp


# --------------------------------- wrapper ------------------------------------
def _round_up(x, m):
    return (x + m - 1) // m * m


def _pack_head_params(wmu, bmu, wls, bls):
    w = jnp.concatenate([wmu, wls], axis=1)                                  # (L, 2A)
    b = jnp.concatenate([bmu.reshape(1, -1), bls.reshape(1, -1)], axis=1)    # (1, 2A)
    return w, b


def gaussian_policy_head(x, wmu, bmu, wls, bls, *, act_limit=1.0,
                         deterministic=False, with_logprob=True, actions=None,
                         b_tile=128, eps=1e-6):
    """Pallas TPU implementation of GaussianPolicyHead.forward.

    x: (B, latent_dim) f32. Weights: wmu/wls (latent_dim, act_dim), bmu/bls (act_dim,).
    """
    B, L = x.shape
    A = wmu.shape[1]
    w, b = _pack_head_params(wmu, bmu, wls, bls)

    bt = _round_up(min(b_tile, _round_up(B, 8)), 8)     # batch tile, multiple of 8 sublanes
    Bp = _round_up(B, bt)
    num_tiles = Bp // bt
    pad = Bp - B
    xp = jnp.pad(x, ((0, pad), (0, 0))) if pad else x

    x_spec = pl.BlockSpec((bt, L), lambda i: (i, 0))
    w_spec = pl.BlockSpec(w.shape, lambda i: (0, 0))
    b_spec = pl.BlockSpec(b.shape, lambda i: (0, 0))
    cparams = pltpu.CompilerParams(dimension_semantics=("parallel",))

    if actions is not None:
        ap = jnp.pad(actions, ((0, pad), (0, 0))) if pad else actions
        a_spec = pl.BlockSpec((bt, A), lambda i: (i, 0))
        kernel = functools.partial(_given_actions_kernel, act_dim=A,
                                   act_limit=float(act_limit), eps=float(eps))
        logp = pl.pallas_call(
            kernel,
            grid=(num_tiles,),
            in_specs=[x_spec, a_spec, w_spec, b_spec],
            out_specs=pl.BlockSpec((bt, 1), lambda i: (i, 0)),
            out_shape=jax.ShapeDtypeStruct((Bp, 1), jnp.float32),
            compiler_params=cparams,
        )(xp, ap, w, b)
        return actions, logp[:B, 0]

    if not deterministic:
        # TODO(synk): stochastic rsample path requires in-kernel Gaussian noise
        # (pltpu.prng_seed + pltpu.stateful_normal); only the mean-action path is implemented.
        raise NotImplementedError("stochastic rsample path not implemented in the Pallas kernel")

    kernel = functools.partial(_deterministic_kernel, act_dim=A, act_limit=float(act_limit))
    act, logp = pl.pallas_call(
        kernel,
        grid=(num_tiles,),
        in_specs=[x_spec, w_spec, b_spec],
        out_specs=[pl.BlockSpec((bt, A), lambda i: (i, 0)),
                   pl.BlockSpec((bt, 1), lambda i: (i, 0))],
        out_shape=[jax.ShapeDtypeStruct((Bp, A), jnp.float32),
                   jax.ShapeDtypeStruct((Bp, 1), jnp.float32)],
        compiler_params=cparams,
    )(xp, w, b)
    act = act[:B]
    logp_out = logp[:B, 0] if with_logprob else None
    return act, logp_out


# ----------------------------------- main --------------------------------------
if __name__ == "__main__":
    LATENT, ACT_DIM, ACT_LIMIT = 32, 2, 1.0
    key = jax.random.PRNGKey(0)
    kw1, kb1, kw2, kb2, kx, ka, kx2 = jax.random.split(key, 7)

    wmu = 0.1 * jax.random.normal(kw1, (LATENT, ACT_DIM), jnp.float32)
    bmu = 0.1 * jax.random.normal(kb1, (ACT_DIM,), jnp.float32)
    wls = 0.1 * jax.random.normal(kw2, (LATENT, ACT_DIM), jnp.float32)
    bls = 0.1 * jax.random.normal(kb2, (ACT_DIM,), jnp.float32)

    def ref_det(x):
        mu = x @ wmu + bmu
        log_std = jnp.clip(x @ wls + bls, LOG_STD_MIN, LOG_STD_MAX)
        logp = jnp.sum(-log_std - 0.5 * jnp.log(2.0 * jnp.pi), axis=-1)
        logp = logp - jnp.sum(2.0 * (jnp.log(2.0) - mu - jax.nn.softplus(-2.0 * mu)), axis=-1)
        return ACT_LIMIT * jnp.tanh(mu), logp

    def ref_actions(x, a, eps=1e-6):
        mu = x @ wmu + bmu
        log_std = jnp.clip(x @ wls + bls, LOG_STD_MIN, LOG_STD_MAX)
        std = jnp.exp(log_std)
        u = jnp.arctanh(jnp.clip(a / ACT_LIMIT, -1.0 + eps, 1.0 - eps))
        logp = jnp.sum(-0.5 * ((u - mu) / std) ** 2 - log_std - 0.5 * jnp.log(2.0 * jnp.pi), axis=-1)
        logp = logp - jnp.sum(2.0 * (jnp.log(2.0) - u - jax.nn.softplus(-2.0 * u)), axis=-1)
        return a, logp

    # --- small batch (pads to a single 8-row tile) ---
    B = 2
    x = jax.random.normal(kx, (B, LATENT), jnp.float32)
    a_in = jnp.tanh(jax.random.normal(ka, (B, ACT_DIM), jnp.float32)) * ACT_LIMIT

    act, logp = gaussian_policy_head(x, wmu, bmu, wls, bls, act_limit=ACT_LIMIT,
                                     deterministic=True, with_logprob=True)
    jax.block_until_ready((act, logp))
    ra, rl = ref_det(x)
    np.testing.assert_allclose(np.asarray(act), np.asarray(ra), rtol=1e-4, atol=1e-4)
    np.testing.assert_allclose(np.asarray(logp), np.asarray(rl), rtol=1e-4, atol=1e-4)

    _, logp_a = gaussian_policy_head(x, wmu, bmu, wls, bls, act_limit=ACT_LIMIT, actions=a_in)
    jax.block_until_ready(logp_a)
    _, rl_a = ref_actions(x, a_in)
    np.testing.assert_allclose(np.asarray(logp_a), np.asarray(rl_a), rtol=1e-4, atol=1e-4)

    # --- larger batch: exercises the multi-tile grid (2 x 128-row tiles -> both v7x TensorCores) ---
    B2 = 256
    x2 = jax.random.normal(kx2, (B2, LATENT), jnp.float32)
    act2, logp2 = gaussian_policy_head(x2, wmu, bmu, wls, bls, act_limit=ACT_LIMIT,
                                       deterministic=True, with_logprob=True)
    jax.block_until_ready((act2, logp2))
    ra2, rl2 = ref_det(x2)
    np.testing.assert_allclose(np.asarray(act2), np.asarray(ra2), rtol=1e-4, atol=1e-4)
    np.testing.assert_allclose(np.asarray(logp2), np.asarray(rl2), rtol=1e-4, atol=1e-4)

    print("KERNEL_OK")
</pallas_src>

<mosaic_0001>
module attributes {stable_mosaic.version = 11 : i64} {
  func.func @_deterministic_kernel(%arg0: i32, %arg1: memref<8x32xf32, #tpu.memory_space<vmem>>, %arg2: memref<32x4xf32, #tpu.memory_space<vmem>>, %arg3: memref<1x4xf32, #tpu.memory_space<vmem>>, %arg4: memref<8x2xf32, #tpu.memory_space<vmem>>, %arg5: memref<8x1xf32, #tpu.memory_space<vmem>>) attributes {dimension_semantics = [#tpu.dimension_semantics<parallel>], iteration_bounds = array<i64: 1>, scalar_prefetch = 0 : i64, scratch_operands = 0 : i64, tpu.core_type = #tpu.core_type<tc>, window_params = [{transform_indices = @transform_0, window_bounds = array<i64: 8, 32>}, {pipeline_mode = #tpu.pipeline_mode<synchronous>, transform_indices = @transform_1, window_bounds = array<i64: 32, 4>}, {pipeline_mode = #tpu.pipeline_mode<synchronous>, transform_indices = @transform_2, window_bounds = array<i64: 1, 4>}, {transform_indices = @transform_3, window_bounds = array<i64: 8, 2>}, {transform_indices = @transform_4, window_bounds = array<i64: 8, 1>}]} {
    %c0 = arith.constant 0 : index
    %c0_0 = arith.constant 0 : index
    %0 = vector.load %arg1[%c0, %c0_0] : memref<8x32xf32, #tpu.memory_space<vmem>>, vector<8x32xf32>
    %c0_1 = arith.constant 0 : index
    %c0_2 = arith.constant 0 : index
    %1 = vector.load %arg2[%c0_1, %c0_2] : memref<32x4xf32, #tpu.memory_space<vmem>>, vector<32x4xf32>
    %cst = arith.constant dense<0.000000e+00> : vector<8x4xf32>
    %2 = tpu.matmul %0, %1, %cst {dimension_numbers = #tpu.dot_dimension_numbers<[1], [0], [0], [1], [0, 0, 1, 1], [], []>} : vector<8x32xf32>, vector<32x4xf32>, vector<8x4xf32> -> vector<8x4xf32>
    %c0_3 = arith.constant 0 : index
    %c0_4 = arith.constant 0 : index
    %3 = vector.load %arg3[%c0_3, %c0_4] : memref<1x4xf32, #tpu.memory_space<vmem>>, vector<1x4xf32>
    %4 = vector.broadcast %3 : vector<1x4xf32> to vector<8x4xf32>
    %5 = arith.addf %2, %4 : vector<8x4xf32>
    %6 = vector.extract_strided_slice %5 {offsets = [0, 0], sizes = [8, 2], strides = [1, 1]} : vector<8x4xf32> to vector<8x2xf32>
    %7 = vector.extract_strided_slice %5 {offsets = [0, 2], sizes = [8, 2], strides = [1, 1]} : vector<8x4xf32> to vector<8x2xf32>
    %cst_5 = arith.constant -2.000000e+01 : f32
    %cst_6 = arith.constant 2.000000e+00 : f32
    %8 = vector.broadcast %cst_5 : f32 to vector<8x2xf32>
    %9 = arith.maximumf %8, %7 : vector<8x2xf32>
    %10 = vector.broadcast %cst_6 : f32 to vector<8x2xf32>
    %11 = arith.minimumf %10, %9 : vector<8x2xf32>
    %cst_7 = arith.constant 0.000000e+00 : f32
    %12 = vector.broadcast %cst_7 : f32 to vector<8x2xf32>
    %13 = arith.subf %12, %11 : vector<8x2xf32>
    %cst_8 = arith.constant 0.918938517 : f32
    %14 = vector.broadcast %cst_8 : f32 to vector<8x2xf32>
    %15 = arith.subf %13, %14 : vector<8x2xf32>
    %cst_9 = arith.constant dense<0.000000e+00> : vector<8xf32>
    %16 = vector.multi_reduction <add>, %15, %cst_9 [1] : vector<8x2xf32> to vector<8xf32>
    %17 = vector.shape_cast %16 : vector<8xf32> to vector<8x1xf32>
    %cst_10 = arith.constant 0.693147182 : f32
    %18 = vector.broadcast %cst_10 : f32 to vector<8x2xf32>
    %19 = arith.subf %18, %6 : vector<8x2xf32>
    %cst_11 = arith.constant -2.000000e+00 : f32
    %20 = vector.broadcast %cst_11 : f32 to vector<8x2xf32>
    %21 = arith.mulf %20, %6 : vector<8x2xf32>
    %cst_12 = arith.constant 0.000000e+00 : f32
    %22 = vector.broadcast %cst_12 : f32 to vector<8x2xf32>
    %23 = arith.maximumf %21, %22 : vector<8x2xf32>
    %24 = vector.broadcast %cst_12 : f32 to vector<8x2xf32>
    %25 = arith.subf %21, %24 : vector<8x2xf32>
    %26 = arith.cmpf one, %25, %25 : vector<8x2xf32>
    %27 = vector.broadcast %cst_12 : f32 to vector<8x2xf32>
    %28 = arith.addf %21, %27 : vector<8x2xf32>
    %29 = math.absf %25 : vector<8x2xf32>
    %cst_13 = arith.constant 0.000000e+00 : f32
    %30 = vector.broadcast %cst_13 : f32 to vector<8x2xf32>
    %31 = arith.subf %30, %29 : vector<8x2xf32>
    %32 = math.exp %31 : vector<8x2xf32>
    %33 = math.log1p %32 : vector<8x2xf32>
    %34 = arith.addf %23, %33 : vector<8x2xf32>
    %35 = arith.select %26, %28, %34 : vector<8x2xi1>, vector<8x2xf32>
    %36 = arith.subf %19, %35 : vector<8x2xf32>
    %cst_14 = arith.constant 2.000000e+00 : f32
    %37 = vector.broadcast %cst_14 : f32 to vector<8x2xf32>
    %38 = arith.mulf %37, %36 : vector<8x2xf32>
    %cst_15 = arith.constant dense<0.000000e+00> : vector<8xf32>
    %39 = vector.multi_reduction <add>, %38, %cst_15 [1] : vector<8x2xf32> to vector<8xf32>
    %40 = vector.shape_cast %39 : vector<8xf32> to vector<8x1xf32>
    %41 = arith.subf %17, %40 : vector<8x1xf32>
    %42 = math.tanh %6 : vector<8x2xf32>
    %cst_16 = arith.constant 1.000000e+00 : f32
    %43 = vector.broadcast %cst_16 : f32 to vector<8x2xf32>
    %44 = arith.mulf %43, %42 : vector<8x2xf32>
    %c0_17 = arith.constant 0 : index
    %c0_18 = arith.constant 0 : index
    %45 = vector.load %arg4[%c0_17, %c0_18] : memref<8x2xf32, #tpu.memory_space<vmem>>, vector<8x2xf32>
    tpu.vector_store %arg4[%c0_17, %c0_18], %44 {strides = array<i32>} : memref<8x2xf32, #tpu.memory_space<vmem>>, vector<8x2xf32>,
    %c0_19 = arith.constant 0 : index
    %c0_20 = arith.constant 0 : index
    %46 = vector.load %arg5[%c0_19, %c0_20] : memref<8x1xf32, #tpu.memory_space<vmem>>, vector<8x1xf32>
    tpu.vector_store %arg5[%c0_19, %c0_20], %41 {strides = array<i32>} : memref<8x1xf32, #tpu.memory_space<vmem>>, vector<8x1xf32>,
    return
  }
  func.func @transform_0(%arg0: i32) -> (i32, i32) {
    %c0_i32 = arith.constant 0 : i32
    %c0_i32_0 = arith.constant 0 : i32
    return %arg0, %c0_i32 : i32, i32
  }
  func.func @transform_1(%arg0: i32) -> (i32, i32) {
    %c0_i32 = arith.constant 0 : i32
    %c0_i32_0 = arith.constant 0 : i32
    %c0_i32_1 = arith.constant 0 : i32
    return %c0_i32, %c0_i32_0 : i32, i32
  }
  func.func @transform_2(%arg0: i32) -> (i32, i32) {
    %c0_i32 = arith.constant 0 : i32
    %c0_i32_0 = arith.constant 0 : i32
    %c0_i32_1 = arith.constant 0 : i32
    return %c0_i32, %c0_i32_0 : i32, i32
  }
  func.func @transform_3(%arg0: i32) -> (i32, i32) {
    %c0_i32 = arith.constant 0 : i32
    %c0_i32_0 = arith.constant 0 : i32
    return %arg0, %c0_i32 : i32, i32
  }
  func.func @transform_4(%arg0: i32) -> (i32, i32) {
    %c0_i32 = arith.constant 0 : i32
    %c0_i32_0 = arith.constant 0 : i32
    return %arg0, %c0_i32 : i32, i32
  }
}

</mosaic_0001>

<bundles_post_ra>
// kernel: tpu_custom_call.1
= control target key start
LH: loop header
LB: loop body
LE: loop exit
PB: predicated region body
PF: predicated region fallthrough
CT: control target
= control target key end

     0   :  { %v180_v0 = vmov 0.0   ;;  %vm181_vm0 = vmmov 0   ;;  %vm28_vm1 = vcmask 261120   ;;  %vm110_vm2 = vcmask 15360   ;;  %s235_s1 = inlined_call_operand.vmem [shape: f32[32,4], index: 1, kind: input, shape index: {}]   ;;  %s236_s0 = inlined_call_operand.vmem [shape: f32[8,32], index: 0, kind: input, shape index: {}]   ;;  %s237_s2 = inlined_call_operand.vmem [shape: f32[1,4], index: 2, kind: input, shape index: {}]   ;;  %s238_s3 = inlined_call_operand.vmem [shape: f32[8,2], index: 3, kind: output, shape index: {0}]   ;;  %s239_s4 = inlined_call_operand.vmem [shape: f32[8,1], index: 4, kind: output, shape index: {1}]  }
   0x1   :  { %160 = vmatprep.subr.mxu0 %v180_v0  ;;  %v20_v1 = vld [vmem:[%s235_s1 + $0x18] sm:$0xff]  ;;  %v19_v2 = vld [vmem:[%s235_s1 + $0x10] sm:$0xff]  ;;  %168 = vmatprep.mubr.msk.f32.mxu0 %vm181_vm0, %v180_v0  ;;  %v18_v3 = vld [vmem:[%s235_s1 + $0x8] sm:$0xff]  ;;  %vm142_vm5 = vcmask 7168  }
   0x2   :  { %161 = vmatpush3.msra.mxu0 %v20_v1  ;;  %v17_v4 = vld [vmem:[%s235_s1] sm:$0xff] }
   0x3   :  { %162 = vmatprep.subr.mxu0 %v180_v0  ;;  %v16_v5 = vld [vmem:[%s236_s0] sm:$0xff]  ;;  %s182_s0 = smov 126  }
   0x4   :  { %163 = vmatpush3.msra.mxu0 %v19_v2  ;;  %v152_v6 = vld [vmem:[%s237_s2] ss:$0 sm:$0xff] }
   0x5   :  { %164 = vmatprep.subr.mxu0 %v180_v0 }
   0x6   :  { %165 = vmatpush3.msra.mxu0 %v18_v3 }
   0x7   :  { %166 = vmatprep.subr.mxu0 %v180_v0 }
   0x8   :  { %167 = vmatpush3.msra.mxu0 %v17_v4 }
   0x9   :  { %169 = vmatmul.mubr.msk.f32.vlgmr.msra.gmra.mxu0 %vm28_vm1, %v16_v5 }
  0xc9   :  { %v98_v7 = vpop.f32.mrf.mxu0 }
  0xca   :  { %v99_v8 = vadd.f32 %v152_v6, %v98_v7 }
  0xcb   :  { %v170_v9 = vpop.f32.mrf.mxu0 }
  0xcc   :  { %v115_v10 = vmul.f32 -2.0, %v99_v8  ;;  %174 = vtanh.f32 %v99_v8  ;;  %v102_v11 = vmax.f32 %v99_v8, -20.0  ;;  %v114_v30 = vsub.f32 0.6931472, %v99_v8 }
  0xce   :  { %v119_v12 = vand.u32 2147483647, %v115_v10  ;;  %v103_v13 = vmin.f32 %v102_v11, 2.0  ;;  %v116_v27 = vmax.f32 %v115_v10, 0.0  ;;  %vm117_vm4 = vcmp.ne.f32.partialorder %v115_v10, %v115_v10 }
  0xd0   :  { %v120_v14 = vsub.f32 0.0, %v119_v12  ;;  %v104_v15 = vsub.f32 0.0, %v103_v13 }
  0xd2   :  { %v121_v16 = vmul.f32 1.442695, %v120_v14  ;;  %v154_v17 = vadd.f32 -0.9189385, %v104_v15 }
  0xd4   :  { %176 = vpow2.f32 %v121_v16  ;;  %107 = vrot.lane.b32.xlu0 %v154_v17, %s182_s0 }
  0xd9   :  { %v175_v18 = vpop.eup %174 }
  0xda   :  { %141 = vst.msk [vmem:[%s238_s3] sm:$0xff] %vm110_vm2, %v175_v18 }
  0xe1   :  { %v177_v19 = vpop.eup %176 }
  0xe2   :  { %v123_v20 = vadd.f32 1.0, %v177_v19  ;;  %v126_v21 = vmul.f32 -0.5, %v177_v19  ;;  %v129_v23 = vand.u32 2147483647, %v177_v19 }
  0xe4   :  { %178 = vlog2.f32 %v123_v20  ;;  %v127_v22 = vadd.f32 1.0, %v126_v21  ;;  %vm130_vm3 = vcmp.lt.f32.partialorder %v129_v23, 0.0004427343 }
  0xe6   :  { %v128_v26 = vmul.f32 %v177_v19, %v127_v22 }
  0xf1   :  { %v179_v24 = vpop.eup %178 }
  0xf2   :  { %v125_v25 = vmul.f32 0.6931472, %v179_v24 }
  0xf4   :  { %v131_v28 = vsel %vm130_vm3, %v128_v26, %v125_v25 }
  0xf5   :  { %v132_v29 = vadd.f32 %v131_v28, %v116_v27 }
  0xf7   :  { %v133_v31 = vsel %vm117_vm4, %v115_v10, %v132_v29 }
  0xf8   :  { %v134_v32 = vsub.f32 %v114_v30, %v133_v31 }
  0xfa   :  { %v135_v33 = vmul.f32 2.0, %v134_v32 }
  0xfc   :  { %v136_v34 = vsel %vm110_vm2, %v135_v33, 0.0 }
  0xfd   :  { %137 = vadd.xlane.f32.xlu1 %v136_v34 }
 0x146   :  { %v108_v35 = vpop.permute.xlu0 %107 }
 0x147   :  { %v111_v36 = vsel %vm110_vm2, %v108_v35, 0.0 }
 0x148   :  { %112 = vadd.xlane.f32.xlu0 %v111_v36 }
 0x186   :  { %v138_v37 = vpop.xlane.xlu1 %137 }
 0x1d1   :  { %v113_v38 = vpop.xlane.xlu0 %112 }
 0x1d2   :  { %v139_v39 = vsub.f32 %v113_v38, %v138_v37 }
 0x1d4   :  { %143 = vst.msk [vmem:[%s239_s4] sm:$0xff] %vm142_vm5, %v139_v39 }

</bundles_post_ra>
